<compile_context>
chip_gen: v5e
topology: v5e:2x2
jax: 0.10.0
libtpu: 0.0.40
codegen_flags: <defaults>
</compile_context>

<pallas_src>
import functools

import jax
import jax.numpy as jnp
import numpy as np
from jax import lax
from jax.experimental import pallas as pl
from jax.experimental.pallas import tpu as pltpu

_LANE = 128
_MIB = 2 ** 20


def _round_up(x: int, m: int) -> int:
    return ((x + m - 1) // m) * m


def _cdiv(a: int, b: int) -> int:
    return -(-a // b)


def _selector(idx_ref, tile_n, chunk_rows, chunk_start, table_dtype):
    """Build the F-hot selector (tile_n, chunk_rows) for the current card chunk.

    idx_ref holds per-row indices already offset into the combined-table row
    space (invalid ones remapped to a sentinel that never matches).
    """
    num_features = idx_ref.shape[1]
    iota = lax.broadcasted_iota(jnp.int32, (tile_n, chunk_rows), 1)

    def col(f):
        c = idx_ref[:, f:f + 1]                 # (tile_n, 1)
        return c if chunk_start is None else c - chunk_start

    hot = iota == col(0)
    for f in range(1, num_features):
        hot = hot | (iota == col(f))
    # Feature row ranges are disjoint, so OR is exact.  Cast to the table dtype
    # so bf16 tables hit the single-pass bf16 MXU path (f32 accumulation via
    # preferred_element_type at the dot).
    return hot.astype(table_dtype)


def _embed_kernel_single(idx_ref, table_ref, out_ref):
    # Whole (padded) block-diagonal table is VMEM-resident; one MXU matmul
    # produces the already-concatenated, lane-dense output tile.
    tile_n = out_ref.shape[0]
    sel = _selector(idx_ref, tile_n, table_ref.shape[0], None, table_ref.dtype)
    out = jnp.dot(sel, table_ref[...], preferred_element_type=jnp.float32)
    out_ref[...] = out.astype(out_ref.dtype)


def _embed_kernel_chunked(idx_ref, table_ref, out_ref, acc_ref, *, card_chunk):
    # Reduction over card chunks (trailing "arbitrary" grid axis): accumulate
    # in f32 VMEM scratch, write the output tile on the last chunk.
    k = pl.program_id(1)

    @pl.when(k == 0)
    def _():
        acc_ref[...] = jnp.zeros_like(acc_ref)

    tile_n = out_ref.shape[0]
    chunk_start = k * card_chunk
    sel = _selector(idx_ref, tile_n, card_chunk, chunk_start, table_ref.dtype)
    acc_ref[...] += jnp.dot(sel, table_ref[...], preferred_element_type=jnp.float32)

    @pl.when(k == pl.num_programs(1) - 1)
    def _():
        out_ref[...] = acc_ref[...].astype(out_ref.dtype)


class FeatureEmbedder:
    """JAX/Pallas port of the PyTorch FeatureEmbedder (fused one-hot matmul)."""

    def __init__(self, cardinalities, embedding_dims, key,
                 dtype=jnp.float32, max_card_chunk=2048):
        assert len(cardinalities) == len(embedding_dims) and len(cardinalities) > 0
        self.num_features = len(cardinalities)
        self.cardinalities = tuple(int(c) for c in cardinalities)
        self.embedding_dims = tuple(int(d) for d in embedding_dims)
        self.total_card = sum(self.cardinalities)
        self.total_dim = sum(self.embedding_dims)
        # Lane-dense output: pad columns to a multiple of 128 (this also gives
        # the 256-wide MXU-native tile automatically when total_dim is 129-255).
        self.dim_pad = _round_up(self.total_dim, _LANE)

        keys = jax.random.split(key, self.num_features)
        # nn.Embedding default init: N(0, 1).  dtype=jnp.bfloat16 halves the
        # resident-table and output-tile VMEM on all generations.
        self.tables = [
            jax.random.normal(k, (c, d), dtype=dtype)
            for k, c, d in zip(keys, self.cardinalities, self.embedding_dims)
        ]

        offsets, acc = [], 0
        for c in self.cardinalities:
            offsets.append(acc)
            acc += c
        self.card_offsets = tuple(offsets)

        itemsize = np.dtype(dtype).itemsize
        # Rows of the combined table processed per grid step: multiple of 8,
        # capped so a double-buffered chunk stays well under per-core VMEM.
        chunk = min(_round_up(max(int(max_card_chunk), 8), 8),
                    _round_up(self.total_card, 8))
        while chunk > 8 and 2 * chunk * self.dim_pad * itemsize > 16 * _MIB:
            chunk = max(8, _round_up(chunk // 2, 8))
        self.card_chunk = chunk
        self.num_chunks = _cdiv(self.total_card, chunk)
        self.total_card_padded = self.num_chunks * chunk
        # Sentinel row index for invalid indices: never matches any iota value.
        self.sentinel = self.total_card_padded

        # Block-diagonal combined table (padded rows/cols are zeros): feature f
        # occupies rows [card_off_f, card_off_f + c_f) and columns
        # [dim_off_f, dim_off_f + d_f).
        # TODO(synk): for many features (F >~ 8) or vocabularies >~10k, the
        # sum(card) x sum(dim) block-diagonal layout is mostly zeros; group
        # features or switch to a scalar-prefetch DMA row-gather instead of
        # the one-hot matmul.
        combined = jnp.zeros((self.total_card_padded, self.dim_pad), dtype=dtype)
        co, do = 0, 0
        for tbl, c, d in zip(self.tables, self.cardinalities, self.embedding_dims):
            combined = combined.at[co:co + c, do:do + d].set(tbl)
            co += c
            do += d
        self.combined_table = combined

        try:
            self._vmem_cap = int(pltpu.get_tpu_info().vmem_capacity_bytes)
        except Exception:
            self._vmem_cap = 64 * _MIB  # conservative (v7x per-core VMEM)

    # ---------------- VMEM accounting ----------------
    def _vmem_footprint(self, tn, table_bufs):
        itemsize = np.dtype(self.combined_table.dtype).itemsize
        acc = 0 if self.num_chunks == 1 else tn * self.dim_pad * 4
        return (
            2 * tn * self.num_features * 4                          # idx (2 bufs)
            + table_bufs * self.card_chunk * self.dim_pad * itemsize
            + 2 * tn * self.dim_pad * itemsize                      # out (2 bufs)
            + acc                                                   # f32 accumulator
            + tn * self.card_chunk * (4 + itemsize)                 # iota + selector temps
        )

    # ---------------- pallas_call construction ----------------
    def _call_kernel(self, feats_g, n_pad, tn, single_buffer_table):
        F = self.num_features
        dim_pad = self.dim_pad
        dtype = self.combined_table.dtype
        row_tiles = n_pad // tn

        if self.num_chunks == 1:
            kernel = _embed_kernel_single
            grid = (row_tiles,)
            idx_spec = pl.BlockSpec((tn, F), lambda i: (i, 0))
            use_single = bool(single_buffer_table) and hasattr(pl, "Buffered")
            tbl_kwargs = {}
            if use_single:
                # Constant block index -> table fetched once; single buffer
                # halves its VMEM residency.
                tbl_kwargs["pipeline_mode"] = pl.Buffered(1)
            tbl_spec = pl.BlockSpec((self.card_chunk, dim_pad), lambda i: (0, 0),
                                    **tbl_kwargs)
            out_spec = pl.BlockSpec((tn, dim_pad), lambda i: (i, 0))
            scratch = []
            dims = ("parallel",)
            table_bufs = 1 if use_single else 2
        else:
            kernel = functools.partial(_embed_kernel_chunked,
                                       card_chunk=self.card_chunk)
            grid = (row_tiles, self.num_chunks)
            idx_spec = pl.BlockSpec((tn, F), lambda i, k: (i, 0))
            tbl_spec = pl.BlockSpec((self.card_chunk, dim_pad), lambda i, k: (k, 0))
            out_spec = pl.BlockSpec((tn, dim_pad), lambda i, k: (i, 0))
            scratch = [pltpu.VMEM((tn, dim_pad), jnp.float32)]
            dims = ("parallel", "arbitrary")
            table_bufs = 2

        cap80 = int(0.8 * self._vmem_cap)
        fp = self._vmem_footprint(tn, table_bufs)
        if fp > cap80:
            raise ValueError(
                f"FeatureEmbedder kernel footprint {fp} B exceeds ~80% of VMEM "
                f"({cap80} B); reduce tile_rows / max_card_chunk or use bf16 tables.")
        vmem_limit = int(min(cap80, max(32 * _MIB, int(1.25 * fp))))

        return pl.pallas_call(
            kernel,
            out_shape=jax.ShapeDtypeStruct((n_pad, dim_pad), dtype),
            grid=grid,
            in_specs=[idx_spec, tbl_spec],
            out_specs=out_spec,
            scratch_shapes=scratch,
            compiler_params=pltpu.CompilerParams(
                dimension_semantics=dims,
                vmem_limit_bytes=vmem_limit,
            ),
        )(feats_g, self.combined_table)

    # ---------------- public forward ----------------
    def __call__(self, features: jax.Array, tile_rows: int = 512) -> jax.Array:
        batch_shape = features.shape[:-1]
        assert features.shape[-1] == self.num_features
        F = self.num_features

        n = 1
        for s in batch_shape:
            n *= int(s)
        n_eff = max(n, 1)

        feats = features.reshape(n, F).astype(jnp.int32)

        # Pre-offset into the combined-table row space (one fused XLA op,
        # removes F in-kernel adds) and remap invalid indices to the sentinel
        # row so they embed to zeros instead of bleeding into the next
        # feature's block.
        offs = jnp.asarray(self.card_offsets, jnp.int32)[None, :]
        cards = jnp.asarray(self.cardinalities, jnp.int32)[None, :]
        valid = (feats >= 0) & (feats < cards)
        feats_g = jnp.where(valid, feats + offs, jnp.int32(self.sentinel))

        # Row tile: multiple of 8.  Allow 1024-row tiles on 128-MiB-VMEM chips
        # (v5e/v6e), keep >= 2 row-grid steps when possible so the "parallel"
        # axis shards across v7x's two TensorCores, and shrink to fit VMEM.
        tn = _round_up(min(max(int(tile_rows), 8), n_eff), 8)
        if self._vmem_cap >= 100 * _MIB and n_eff >= 2048 and tile_rows >= 512:
            tn = max(tn, 1024)
        if n_eff <= 2 * tn:
            tn = _round_up(_cdiv(n_eff, 2), 8)
        while tn > 8 and self._vmem_footprint(tn, table_bufs=2) > int(0.8 * self._vmem_cap):
            tn = max(8, _round_up(tn // 2, 8))

        n_pad = _round_up(n_eff, tn)
        if n_pad != n:
            feats_g = jnp.pad(feats_g, ((0, n_pad - n), (0, 0)),
                              constant_values=self.sentinel)

        if self.num_chunks == 1:
            try:
                out = self._call_kernel(feats_g, n_pad, tn, single_buffer_table=True)
            except Exception:
                # pl.Buffered(1) rejected by this jax/Mosaic version: fall back
                # to the default double-buffered (still constant-index) table.
                out = self._call_kernel(feats_g, n_pad, tn, single_buffer_table=False)
        else:
            out = self._call_kernel(feats_g, n_pad, tn, single_buffer_table=False)

        out = out[:n, :self.total_dim]
        return out.reshape(*batch_shape, self.total_dim)


if __name__ == "__main__":
    key = jax.random.PRNGKey(0)
    k_params, k_feat = jax.random.split(key)

    cardinalities = [7, 11, 5]
    embedding_dims = [3, 4, 6]
    B, T = 2, 8
    F = len(cardinalities)

    # Deterministic integer features, each column within its cardinality.
    fkeys = jax.random.split(k_feat, F)
    features = jnp.concatenate(
        [jax.random.randint(fk, (B, T, 1), 0, c, dtype=jnp.int32)
         for fk, c in zip(fkeys, cardinalities)], axis=-1)          # (B, T, F)

    def reference(tables, feats):
        return jnp.concatenate(
            [jnp.take(tbl, feats[..., i], axis=0) for i, tbl in enumerate(tables)],
            axis=-1)

    # 1) f32, single card chunk (resident table, single-buffered path).
    emb_f32 = FeatureEmbedder(cardinalities, embedding_dims, k_params)
    out = jax.block_until_ready(emb_f32(features))
    ref = reference(emb_f32.tables, features)
    assert out.shape == (B, T, sum(embedding_dims))
    assert jnp.allclose(out, ref, atol=1e-6), "f32 mismatch vs reference gather"

    # 2) bf16 tables (halved VMEM, single-pass bf16 MXU path, f32 accumulation).
    emb_bf16 = FeatureEmbedder(cardinalities, embedding_dims, k_params,
                               dtype=jnp.bfloat16)
    out_bf16 = jax.block_until_ready(emb_bf16(features))
    ref_bf16 = reference(emb_bf16.tables, features)
    assert jnp.allclose(out_bf16.astype(jnp.float32), ref_bf16.astype(jnp.float32),
                        atol=1e-6), "bf16 mismatch vs reference gather"

    # 3) Chunked-reduction path (force >1 card chunk with a tiny chunk cap).
    emb_chunk = FeatureEmbedder(cardinalities, embedding_dims, k_params,
                                max_card_chunk=16)
    assert emb_chunk.num_chunks > 1
    out_chunk = jax.block_until_ready(emb_chunk(features))
    ref_chunk = reference(emb_chunk.tables, features)
    assert jnp.allclose(out_chunk, ref_chunk, atol=1e-6), "chunked-path mismatch"

    # 4) Out-of-range index now embeds to zeros for that feature only
    #    (nn.Embedding would raise; documented divergence).
    features_oob = features.at[0, 0, 1].set(999)
    out_oob = jax.block_until_ready(emb_f32(features_oob))
    assert jnp.allclose(out_oob[0, 0, 3:7], 0.0), "OOB index should embed to zeros"
    assert jnp.allclose(out_oob[0, 0, :3], ref[0, 0, :3], atol=1e-6)
    assert jnp.allclose(out_oob[0, 0, 7:], ref[0, 0, 7:], atol=1e-6)

    print("KERNEL_OK")
</pallas_src>

<mosaic_0001>
module attributes {stable_mosaic.version = 11 : i64} {
  func.func @_embed_kernel_single(%arg0: i32, %arg1: memref<8x3xi32, #tpu.memory_space<vmem>>, %arg2: memref<24x128xf32, #tpu.memory_space<vmem>>, %arg3: memref<8x128xf32, #tpu.memory_space<vmem>>) attributes {dimension_semantics = [#tpu.dimension_semantics<parallel>], iteration_bounds = array<i64: 2>, scalar_prefetch = 0 : i64, scratch_operands = 0 : i64, tpu.core_type = #tpu.core_type<tc>, window_params = [{transform_indices = @transform_0, window_bounds = array<i64: 8, 3>}, {pipeline_mode = #tpu.pipeline_mode<synchronous>, transform_indices = @transform_1, window_bounds = array<i64: 24, 128>}, {transform_indices = @transform_2, window_bounds = array<i64: 8, 128>}]} {
    %0 = tpu.iota {dimensions = array<i32: 1>} : vector<8x24xi32>
    %c0 = arith.constant 0 : index
    %c0_0 = arith.constant 0 : index
    %1 = vector.load %arg1[%c0, %c0_0] : memref<8x3xi32, #tpu.memory_space<vmem>>, vector<8x1xi32>
    %2 = vector.broadcast %1 : vector<8x1xi32> to vector<8x24xi32>
    %3 = arith.cmpi eq, %0, %2 : vector<8x24xi32>
    %c0_1 = arith.constant 0 : index
    %c1 = arith.constant 1 : index
    %4 = vector.load %arg1[%c0_1, %c1] : memref<8x3xi32, #tpu.memory_space<vmem>>, vector<8x1xi32>
    %5 = vector.broadcast %4 : vector<8x1xi32> to vector<8x24xi32>
    %6 = arith.cmpi eq, %0, %5 : vector<8x24xi32>
    %7 = arith.ori %3, %6 : vector<8x24xi1>
    %c0_2 = arith.constant 0 : index
    %c2 = arith.constant 2 : index
    %8 = vector.load %arg1[%c0_2, %c2] : memref<8x3xi32, #tpu.memory_space<vmem>>, vector<8x1xi32>
    %9 = vector.broadcast %8 : vector<8x1xi32> to vector<8x24xi32>
    %10 = arith.cmpi eq, %0, %9 : vector<8x24xi32>
    %11 = arith.ori %7, %10 : vector<8x24xi1>
    %12 = arith.extui %11 : vector<8x24xi1> to vector<8x24xi32>
    %13 = arith.sitofp %12 : vector<8x24xi32> to vector<8x24xf32>
    %c0_3 = arith.constant 0 : index
    %c0_4 = arith.constant 0 : index
    %14 = vector.load %arg2[%c0_3, %c0_4] : memref<24x128xf32, #tpu.memory_space<vmem>>, vector<24x128xf32>
    %cst = arith.constant dense<0.000000e+00> : vector<8x128xf32>
    %15 = tpu.matmul %13, %14, %cst {dimension_numbers = #tpu.dot_dimension_numbers<[1], [0], [0], [1], [0, 0, 1, 1], [], []>} : vector<8x24xf32>, vector<24x128xf32>, vector<8x128xf32> -> vector<8x128xf32>
    %c0_5 = arith.constant 0 : index
    %c0_6 = arith.constant 0 : index
    %16 = vector.load %arg3[%c0_5, %c0_6] : memref<8x128xf32, #tpu.memory_space<vmem>>, vector<8x128xf32>
    tpu.vector_store %arg3[%c0_5, %c0_6], %15 {strides = array<i32>} : memref<8x128xf32, #tpu.memory_space<vmem>>, vector<8x128xf32>,
    return
  }
  func.func @transform_0(%arg0: i32) -> (i32, i32) {
    %c0_i32 = arith.constant 0 : i32
    %c0_i32_0 = arith.constant 0 : i32
    return %arg0, %c0_i32 : i32, i32
  }
  func.func @transform_1(%arg0: i32) -> (i32, i32) {
    %c0_i32 = arith.constant 0 : i32
    %c0_i32_0 = arith.constant 0 : i32
    %c0_i32_1 = arith.constant 0 : i32
    return %c0_i32, %c0_i32_0 : i32, i32
  }
  func.func @transform_2(%arg0: i32) -> (i32, i32) {
    %c0_i32 = arith.constant 0 : i32
    %c0_i32_0 = arith.constant 0 : i32
    return %arg0, %c0_i32 : i32, i32
  }
}

module attributes {stable_mosaic.version = 11 : i64} {
  func.func @_embed_kernel_single(%arg0: i32, %arg1: memref<8x3xi32, #tpu.memory_space<vmem>>, %arg2: memref<24x128xf32, #tpu.memory_space<vmem>>, %arg3: memref<8x128xf32, #tpu.memory_space<vmem>>) attributes {dimension_semantics = [#tpu.dimension_semantics<parallel>], iteration_bounds = array<i64: 2>, scalar_prefetch = 0 : i64, scratch_operands = 0 : i64, tpu.core_type = #tpu.core_type<tc>, window_params = [{transform_indices = @transform_0, window_bounds = array<i64: 8, 3>}, {pipeline_mode = #tpu.pipeline_mode<synchronous>, transform_indices = @transform_1, window_bounds = array<i64: 24, 128>}, {transform_indices = @transform_2, window_bounds = array<i64: 8, 128>}]} {
    %0 = tpu.iota {dimensions = array<i32: 1>} : vector<8x24xi32>
    %c0 = arith.constant 0 : index
    %c0_0 = arith.constant 0 : index
    %1 = vector.load %arg1[%c0, %c0_0] : memref<8x3xi32, #tpu.memory_space<vmem>>, vector<8x1xi32>
    %2 = vector.broadcast %1 : vector<8x1xi32> to vector<8x24xi32>
    %3 = arith.cmpi eq, %0, %2 : vector<8x24xi32>
    %c0_1 = arith.constant 0 : index
    %c1 = arith.constant 1 : index
    %4 = vector.load %arg1[%c0_1, %c1] : memref<8x3xi32, #tpu.memory_space<vmem>>, vector<8x1xi32>
    %5 = vector.broadcast %4 : vector<8x1xi32> to vector<8x24xi32>
    %6 = arith.cmpi eq, %0, %5 : vector<8x24xi32>
    %7 = arith.ori %3, %6 : vector<8x24xi1>
    %c0_2 = arith.constant 0 : index
    %c2 = arith.constant 2 : index
    %8 = vector.load %arg1[%c0_2, %c2] : memref<8x3xi32, #tpu.memory_space<vmem>>, vector<8x1xi32>
    %9 = vector.broadcast %8 : vector<8x1xi32> to vector<8x24xi32>
    %10 = arith.cmpi eq, %0, %9 : vector<8x24xi32>
    %11 = arith.ori %7, %10 : vector<8x24xi1>
    %12 = arith.extui %11 : vector<8x24xi1> to vector<8x24xi32>
    %13 = arith.sitofp %12 : vector<8x24xi32> to vector<8x24xf32>
    %c0_3 = arith.constant 0 : index
    %c0_4 = arith.constant 0 : index
    %14 = vector.load %arg2[%c0_3, %c0_4] : memref<24x128xf32, #tpu.memory_space<vmem>>, vector<24x128xf32>
    %cst = arith.constant dense<0.000000e+00> : vector<8x128xf32>
    %15 = tpu.matmul %13, %14, %cst {dimension_numbers = #tpu.dot_dimension_numbers<[1], [0], [0], [1], [0, 0, 1, 1], [], []>} : vector<8x24xf32>, vector<24x128xf32>, vector<8x128xf32> -> vector<8x128xf32>
    %c0_5 = arith.constant 0 : index
    %c0_6 = arith.constant 0 : index
    %16 = vector.load %arg3[%c0_5, %c0_6] : memref<8x128xf32, #tpu.memory_space<vmem>>, vector<8x128xf32>
    tpu.vector_store %arg3[%c0_5, %c0_6], %15 {strides = array<i32>} : memref<8x128xf32, #tpu.memory_space<vmem>>, vector<8x128xf32>,
    return
  }
  func.func @transform_0(%arg0: i32) -> (i32, i32) {
    %c0_i32 = arith.constant 0 : i32
    %c0_i32_0 = arith.constant 0 : i32
    return %arg0, %c0_i32 : i32, i32
  }
  func.func @transform_1(%arg0: i32) -> (i32, i32) {
    %c0_i32 = arith.constant 0 : i32
    %c0_i32_0 = arith.constant 0 : i32
    %c0_i32_1 = arith.constant 0 : i32
    return %c0_i32, %c0_i32_0 : i32, i32
  }
  func.func @transform_2(%arg0: i32) -> (i32, i32) {
    %c0_i32 = arith.constant 0 : i32
    %c0_i32_0 = arith.constant 0 : i32
    return %arg0, %c0_i32 : i32, i32
  }
}

</mosaic_0001>

<bundles_post_ra>
// kernel: tpu_custom_call.1
= control target key start
LH: loop header
LB: loop body
LE: loop exit
PB: predicated region body
PF: predicated region fallthrough
CT: control target
= control target key end

     0   :  { %7 = vsyncpa [#allocation3], 0  ;;  %s579_s0 = inlined_call_operand.vmem [shape: s32[16,3], index: 0, kind: input, shape index: {}]   ;;  %s580_s1 = inlined_call_operand.hbm [shape: f32[24,128], index: 1, kind: input, shape index: {}]   ;;  %s581_s2 = inlined_call_operand.hbm [shape: f32[16,128], index: 2, kind: output, shape index: {}]  }
   0x1   :  { %8 = vsyncpa [#allocation4], 0 }
   0x2   :  { %10 = vsyncpa [#allocation4 + $0x1], 0  ;;  %s484_s9 = smov 0   ;;  %s486_s10 = smov 0  }
   0x3   :  { %s488_s11 = smov 0   ;;  %s490_s12 = smov 0  }
   0x4 LB: > { %s505_s13 = sadd.s32 4294967295, %s460_s12   ;;  %s290_s14 = sadd.s32 4294967294, %s460_s12   ;;  %s460_s12 = sphi %s490_s12, %s587_s12   ;;  %s456_s11 = sphi %s488_s11, %s586_s11   ;;  %s452_s10 = sphi %s486_s10, %s585_s10   ;;  %s448_s9 = sphi %s484_s9, %s584_s9  }
   0x5   : > { %s509_s15 = sadd.s32 1, %s460_s12   ;;  %s70_s16 = sadd.s32 1, %s456_s11 }
   0x6   : > { %s67_s17 = ssub.s32 %s460_s12, %s509_s15  ;;  %p80_p0 = scmp.ne.s32.totalorder %s456_s11, %s452_s10 }
   0x7   : > { %p68_p1 = scmp.eq.s32.totalorder %s67_s17, 0  ;;  %p81_p2 = scmp.eq.s32.totalorder %s505_s13, 1 }
   0x8   : > { %p86_p3 = scmp.ne.s32.totalorder %s452_s10, %s448_s9  ;;  %p87_p4 = scmp.eq.s32.totalorder %s290_s14, 1 }
   0x9   : > { %s520_s18 = scalar_select %p68_p1, %s456_s11, %s70_s16  }
   0xa   : > { %p522_p5 = por %p81_p2, %p80_p0  ;;  %p526_p6 = por %p87_p4, %p86_p3 }
   0xb   : > { %p291_p7 = scmp.ge.s32.totalorder %s460_s12, 1  ;;  %p94_p8 = scmp.lt.s32.totalorder %s460_s12, 3 }
   0xc   : > { %p318_p9 = scmp.eq.s32.totalorder %s505_s13, 0  ;;  %s105_s23 = sshll.u32 %s580_s1, 4  ;;  %s106_s23 = int_to_ptr.hbm [resolvable:$true] %s105_s23 }
   0xd   : > { %p95_p10 = pnand %p291_p7, %p94_p8  ;;  %s462_s24 = smov [#allocation2]  }
   0xe   : > { %s107_s25 = sshll.u32 %s462_s24, 4  ;;  %s463_s26 = smov 128   ;;  %s108_s25 = int_to_ptr.vmem [resolvable:$true] %s107_s25 }
   0xf   : > { %p310_p11 = pneg %p95_p10  ;;  %s464_s27 = smov 8  }
  0x10   : > { %130 = sbr.rel (%p95_p10) target bundleno = 286 (0x11e), region = 28 }
  0x11   : > { %p311_p12 = pnand %p318_p9, %p310_p11 }
  0x13   : > { %313 = dma.hbm_to_vmem [thread:$0]  (!%p311_p12), %s106_s23, 384, %s108_s25, [#allocation3], %s463_s26, %s463_s26, %s464_s27  }
  0x15   : > { %439 = dma.done.wait (%p318_p9), [#allocation3], 384  }
  0x16   : > { %441 = vsyncadd (%p318_p9), [#allocation3], 4294966912  ;;  %p152_p13 = scmp.lt.s32.totalorder %s505_s13, 1  ;;  %v465_v0 = vmov 0   ;;  %v466_v1 = vmov 2   ;;  %v467_v3 = vmov 1   ;;  %v156_v8 = vlaneseq }
  0x17   : > { %360 = vset.pattern.permute.xlu0 %v465_v0  ;;  %362 = vset.pattern.permute.xlu1 %v466_v1  ;;  %v177_v4 = vld [vmem:[#allocation2 + $0x10] sm:$0xff]  ;;  %v176_v5 = vld [vmem:[#allocation2 + $0x8] sm:$0xff]  ;;  %v175_v6 = vld [vmem:[#allocation2] sm:$0xff]  ;;  %vm178_vm4 = vcmask 195584   ;;  %v468_v12 = vmov 0.0   ;;  %s149_s5 = sand.u32 1, %s452_s10  }
  0x18   : > { %s153_s28 = scalar_select %p152_p13, %s505_s13, 1  ;;  %195 = vmatpush.msra.mxu0 %v177_v4  ;;  %v157_v9 = vand.u32 127, %v156_v8 }
  0x19   : > { %s296_s6 = sshll.u32 %s149_s5, 3  ;;  %s301_s7 = sshll.u32 %s505_s13, 3 }
  0x1a   : > { %s297_s29 = sshll.u32 %s153_s28, 3  ;;  %196 = vmatpush.msra.mxu0 %v176_v5  ;;  %s214_s16 = scalar_lea.hbm %s581_s2, %s301_s7 }
  0x1b   : > { %s155_s4 = scalar_lea.vmem %s579_s0, %s297_s29  ;;  %s151_s17 = scalar_lea.vmem [#allocation5], %s296_s6 }
  0x1c   : > { %v158_v2 = vld [vmem:[%s155_s4] sm:$0xff]  ;;  %197 = vmatpush.msra.mxu0 %v175_v6  ;;  %s216_s21 = sshll.u32 %s151_s17, 4  ;;  %s218_s22 = sshll.u32 %s214_s16, 4  ;;  %s217_s21 = int_to_ptr.vmem [resolvable:$true] %s216_s21  ;;  %s219_s22 = int_to_ptr.hbm [resolvable:$true] %s218_s22 }
  0x1d   : > { %160 = vperm.xlu0 %360, %v158_v2   ;;  %169 = vperm.xlu1 %362, %v158_v2   ;;  %s204_s23 = scalar_lea.sflag [#allocation4], %s149_s5  ;;  %s408_s24 = sshra.s32 %s219_s22, 4  ;;  %s409_s24 = int_to_ptr.hbm [resolvable:$true] %s408_s24 }
  0x1e   : > { %s410_s25 = scalar_lea.hbm %s409_s24, 8  ;;  %s414_s27 = scalar_lea.hbm %s581_s2, 16 }
  0x1f   : > { %p411_p0 = scmp.ne.s32.totalorder %s409_s24, %s410_s25  ;;  %p415_p3 = scmp.lt.s32.totalorder %s409_s24, %s581_s2 }
  0x20   : > { %p416_p4 = scmp.lt.s32.totalorder %s414_s27, %s410_s25 }
  0x21   : > { %p412_p1 = pnand %p411_p0, %p522_p5 }
  0x22   : > { %p417_p7 = por %p416_p4, %p415_p3 }
  0x23   : > { %p413_p2 = pneg %p412_p1 }
  0x25   : > { %361 = vset.pattern.permute.xlu0 %v467_v3  ;;  %p418_p8 = pnand %p417_p7, %p413_p2 }
  0x26   : > { %164 = vperm.xlu0 %361, %v158_v2  }
  0x2e   : > { %363 = vset.pattern.permute.xlu0 %v466_v1 }
  0x8f   : > { %v161_v7 = vpop.permute.xlu0 %160  ;;  %v170_v10 = vpop.permute.xlu1 %169 }
  0x90   : > { %vm171_vm0 = vcmp.eq.s32.totalorder %v157_v9, %v170_v10  ;;  %vm162_vm1 = vcmp.eq.s32.totalorder %v157_v9, %v161_v7 }
  0x98   : > { %v165_v11 = vpop.permute.xlu0 %164 }
  0x99   : > { %vm166_vm2 = vcmp.eq.s32.totalorder %v157_v9, %v165_v11 }
  0x9a   : > { %vm167_vm3 = vmor %vm162_vm1, %vm166_vm2 }
  0x9b   : > { %vm172_vm5 = vmor %vm167_vm3, %vm171_vm0 }
  0x9c   : > { %v298_v13 = vsel %vm172_vm5, 1.0, %v468_v12 }
  0x9d   : > { %299 = vmatmul.msk.f32.vlgmr.msra.gmra.mxu0 %vm178_vm4, %v298_v13 }
 0x11a   : > { %v199_v14 = vpop.f32.mrf.mxu0 }
 0x11b   : > { %202 = vst [vmem:[%s151_s17] sm:$0xff] %v199_v14 }
 0x11c   : > { %421 = shalt.err (!%p418_p8)
}
 0x11d   : > { %308 = dma.vmem_to_hbm [thread:$0]  (%p522_p5), %s217_s21, 128, %s219_s22, %s204_s23  }
 0x11e PF: > { %p320_p9 = scmp.ge.s32.totalorder %s460_s12, 2  ;;  %s230_s30 = sand.u32 1, %s448_s9  }
 0x11f   : > { %s231_s3 = scalar_lea.sflag [#allocation4], %s230_s30 }
 0x120   : > { %p315_p10 = pnand %p320_p9, %p526_p6 }
 0x122   : > { %p316_p11 = pneg %p315_p10 }
 0x124   : > { %443 = dma.done.wait (%p316_p11), %s231_s3, 128  }
 0x125   : > { %445 = vsyncadd (%p316_p11), %s231_s3, 4294967168  ;;  %p13_p12 = scmp.ge.s32.totalorder %s509_s15, 4   ;;  %s584_s9 = smov %s452_s10 }
 0x126   : > { %s585_s10 = smov %s456_s11  ;;  %s586_s11 = smov %s520_s18 }
 0x127   : > { %s587_s12 = smov %s509_s15  ;;  %15 = sbr.rel (!%p13_p12) target bundleno = 4 (0x4), region = 68 }
 0x12c   :  { %237 = vsyncpa [#allocation3], 1 }
 0x12d   :  { %239 = vsyncpa [#allocation3 + $0x1], 1 }
 0x12e   :  { %240 = vsyncpa [#allocation4], 1 }
 0x12f   :  { %242 = vsyncpa [#allocation4 + $0x1], 1 }

// kernel: tpu_custom_call.1
= control target key start
LH: loop header
LB: loop body
LE: loop exit
PB: predicated region body
PF: predicated region fallthrough
CT: control target
= control target key end

     0   :  { %7 = vsyncpa [#allocation3], 0  ;;  %s579_s0 = inlined_call_operand.vmem [shape: s32[16,3], index: 0, kind: input, shape index: {}]   ;;  %s580_s1 = inlined_call_operand.hbm [shape: f32[24,128], index: 1, kind: input, shape index: {}]   ;;  %s581_s2 = inlined_call_operand.hbm [shape: f32[16,128], index: 2, kind: output, shape index: {}]  }
   0x1   :  { %8 = vsyncpa [#allocation4], 0 }
   0x2   :  { %10 = vsyncpa [#allocation4 + $0x1], 0  ;;  %s484_s9 = smov 0   ;;  %s486_s10 = smov 0  }
   0x3   :  { %s488_s11 = smov 0   ;;  %s490_s12 = smov 0  }
   0x4 LB: > { %s505_s13 = sadd.s32 4294967295, %s460_s12   ;;  %s290_s14 = sadd.s32 4294967294, %s460_s12   ;;  %s460_s12 = sphi %s490_s12, %s587_s12   ;;  %s456_s11 = sphi %s488_s11, %s586_s11   ;;  %s452_s10 = sphi %s486_s10, %s585_s10   ;;  %s448_s9 = sphi %s484_s9, %s584_s9  }
   0x5   : > { %s509_s15 = sadd.s32 1, %s460_s12   ;;  %s70_s16 = sadd.s32 1, %s456_s11 }
   0x6   : > { %s67_s17 = ssub.s32 %s460_s12, %s509_s15  ;;  %p80_p0 = scmp.ne.s32.totalorder %s456_s11, %s452_s10 }
   0x7   : > { %p68_p1 = scmp.eq.s32.totalorder %s67_s17, 0  ;;  %p81_p2 = scmp.eq.s32.totalorder %s505_s13, 1 }
   0x8   : > { %p86_p3 = scmp.ne.s32.totalorder %s452_s10, %s448_s9  ;;  %p87_p4 = scmp.eq.s32.totalorder %s290_s14, 1 }
   0x9   : > { %s520_s18 = scalar_select %p68_p1, %s456_s11, %s70_s16  }
   0xa   : > { %p522_p5 = por %p81_p2, %p80_p0  ;;  %p526_p6 = por %p87_p4, %p86_p3 }
   0xb   : > { %p291_p7 = scmp.ge.s32.totalorder %s460_s12, 1  ;;  %p94_p8 = scmp.lt.s32.totalorder %s460_s12, 3 }
   0xc   : > { %p318_p9 = scmp.eq.s32.totalorder %s505_s13, 0  ;;  %s105_s23 = sshll.u32 %s580_s1, 4  ;;  %s106_s23 = int_to_ptr.hbm [resolvable:$true] %s105_s23 }
   0xd   : > { %p95_p10 = pnand %p291_p7, %p94_p8  ;;  %s462_s24 = smov [#allocation2]  }
   0xe   : > { %s107_s25 = sshll.u32 %s462_s24, 4  ;;  %s463_s26 = smov 128   ;;  %s108_s25 = int_to_ptr.vmem [resolvable:$true] %s107_s25 }
   0xf   : > { %p310_p11 = pneg %p95_p10  ;;  %s464_s27 = smov 8  }
  0x10   : > { %130 = sbr.rel (%p95_p10) target bundleno = 286 (0x11e), region = 28 }
  0x11   : > { %p311_p12 = pnand %p318_p9, %p310_p11 }
  0x13   : > { %313 = dma.hbm_to_vmem [thread:$0]  (!%p311_p12), %s106_s23, 384, %s108_s25, [#allocation3], %s463_s26, %s463_s26, %s464_s27  }
  0x15   : > { %439 = dma.done.wait (%p318_p9), [#allocation3], 384  }
  0x16   : > { %441 = vsyncadd (%p318_p9), [#allocation3], 4294966912  ;;  %p152_p13 = scmp.lt.s32.totalorder %s505_s13, 1  ;;  %v465_v0 = vmov 0   ;;  %v466_v1 = vmov 2   ;;  %v467_v3 = vmov 1   ;;  %v156_v8 = vlaneseq }
  0x17   : > { %360 = vset.pattern.permute.xlu0 %v465_v0  ;;  %362 = vset.pattern.permute.xlu1 %v466_v1  ;;  %v177_v4 = vld [vmem:[#allocation2 + $0x10] sm:$0xff]  ;;  %v176_v5 = vld [vmem:[#allocation2 + $0x8] sm:$0xff]  ;;  %v175_v6 = vld [vmem:[#allocation2] sm:$0xff]  ;;  %vm178_vm4 = vcmask 195584   ;;  %v468_v12 = vmov 0.0   ;;  %s149_s5 = sand.u32 1, %s452_s10  }
  0x18   : > { %s153_s28 = scalar_select %p152_p13, %s505_s13, 1  ;;  %195 = vmatpush.msra.mxu0 %v177_v4  ;;  %v157_v9 = vand.u32 127, %v156_v8 }
  0x19   : > { %s296_s6 = sshll.u32 %s149_s5, 3  ;;  %s301_s7 = sshll.u32 %s505_s13, 3 }
  0x1a   : > { %s297_s29 = sshll.u32 %s153_s28, 3  ;;  %196 = vmatpush.msra.mxu0 %v176_v5  ;;  %s214_s16 = scalar_lea.hbm %s581_s2, %s301_s7 }
  0x1b   : > { %s155_s4 = scalar_lea.vmem %s579_s0, %s297_s29  ;;  %s151_s17 = scalar_lea.vmem [#allocation5], %s296_s6 }
  0x1c   : > { %v158_v2 = vld [vmem:[%s155_s4] sm:$0xff]  ;;  %197 = vmatpush.msra.mxu0 %v175_v6  ;;  %s216_s21 = sshll.u32 %s151_s17, 4  ;;  %s218_s22 = sshll.u32 %s214_s16, 4  ;;  %s217_s21 = int_to_ptr.vmem [resolvable:$true] %s216_s21  ;;  %s219_s22 = int_to_ptr.hbm [resolvable:$true] %s218_s22 }
  0x1d   : > { %160 = vperm.xlu0 %360, %v158_v2   ;;  %169 = vperm.xlu1 %362, %v158_v2   ;;  %s204_s23 = scalar_lea.sflag [#allocation4], %s149_s5  ;;  %s408_s24 = sshra.s32 %s219_s22, 4  ;;  %s409_s24 = int_to_ptr.hbm [resolvable:$true] %s408_s24 }
  0x1e   : > { %s410_s25 = scalar_lea.hbm %s409_s24, 8  ;;  %s414_s27 = scalar_lea.hbm %s581_s2, 16 }
  0x1f   : > { %p411_p0 = scmp.ne.s32.totalorder %s409_s24, %s410_s25  ;;  %p415_p3 = scmp.lt.s32.totalorder %s409_s24, %s581_s2 }
  0x20   : > { %p416_p4 = scmp.lt.s32.totalorder %s414_s27, %s410_s25 }
  0x21   : > { %p412_p1 = pnand %p411_p0, %p522_p5 }
  0x22   : > { %p417_p7 = por %p416_p4, %p415_p3 }
  0x23   : > { %p413_p2 = pneg %p412_p1 }
  0x25   : > { %361 = vset.pattern.permute.xlu0 %v467_v3  ;;  %p418_p8 = pnand %p417_p7, %p413_p2 }
  0x26   : > { %164 = vperm.xlu0 %361, %v158_v2  }
  0x2e   : > { %363 = vset.pattern.permute.xlu0 %v466_v1 }
  0x8f   : > { %v161_v7 = vpop.permute.xlu0 %160  ;;  %v170_v10 = vpop.permute.xlu1 %169 }
  0x90   : > { %vm171_vm0 = vcmp.eq.s32.totalorder %v157_v9, %v170_v10  ;;  %vm162_vm1 = vcmp.eq.s32.totalorder %v157_v9, %v161_v7 }
  0x98   : > { %v165_v11 = vpop.permute.xlu0 %164 }
  0x99   : > { %vm166_vm2 = vcmp.eq.s32.totalorder %v157_v9, %v165_v11 }
  0x9a   : > { %vm167_vm3 = vmor %vm162_vm1, %vm166_vm2 }
  0x9b   : > { %vm172_vm5 = vmor %vm167_vm3, %vm171_vm0 }
  0x9c   : > { %v298_v13 = vsel %vm172_vm5, 1.0, %v468_v12 }
  0x9d   : > { %299 = vmatmul.msk.f32.vlgmr.msra.gmra.mxu0 %vm178_vm4, %v298_v13 }
 0x11a   : > { %v199_v14 = vpop.f32.mrf.mxu0 }
 0x11b   : > { %202 = vst [vmem:[%s151_s17] sm:$0xff] %v199_v14 }
 0x11c   : > { %421 = shalt.err (!%p418_p8)
}
 0x11d   : > { %308 = dma.vmem_to_hbm [thread:$0]  (%p522_p5), %s217_s21, 128, %s219_s22, %s204_s23  }
 0x11e PF: > { %p320_p9 = scmp.ge.s32.totalorder %s460_s12, 2  ;;  %s230_s30 = sand.u32 1, %s448_s9  }
 0x11f   : > { %s231_s3 = scalar_lea.sflag [#allocation4], %s230_s30 }
 0x120   : > { %p315_p10 = pnand %p320_p9, %p526_p6 }
 0x122   : > { %p316_p11 = pneg %p315_p10 }
 0x124   : > { %443 = dma.done.wait (%p316_p11), %s231_s3, 128  }
 0x125   : > { %445 = vsyncadd (%p316_p11), %s231_s3, 4294967168  ;;  %p13_p12 = scmp.ge.s32.totalorder %s509_s15, 4   ;;  %s584_s9 = smov %s452_s10 }
 0x126   : > { %s585_s10 = smov %s456_s11  ;;  %s586_s11 = smov %s520_s18 }
 0x127   : > { %s587_s12 = smov %s509_s15  ;;  %15 = sbr.rel (!%p13_p12) target bundleno = 4 (0x4), region = 68 }
 0x12c   :  { %237 = vsyncpa [#allocation3], 1 }
 0x12d   :  { %239 = vsyncpa [#allocation3 + $0x1], 1 }
 0x12e   :  { %240 = vsyncpa [#allocation4], 1 }
 0x12f   :  { %242 = vsyncpa [#allocation4 + $0x1], 1 }

</bundles_post_ra>
